<compile_context>
chip_gen: v7x
topology: tpu7x:2x2x1
jax: 0.10.0
libtpu: 0.0.40
codegen_flags: <defaults>
</compile_context>

<pallas_src>
import functools

import numpy as np
import jax
import jax.numpy as jnp
from jax.experimental import pallas as pl
from jax.experimental.pallas import tpu as pltpu

_GRAY_R, _GRAY_G, _GRAY_B = 0.2989, 0.587, 0.114  # torchvision grayscale weights


def _rgb_to_hsv(r, g, b):
    # Mirrors torchvision._rgb2hsv for float tensors, except the returned hue is
    # NOT wrapped to [0,1): the only caller (the hue op) adds its offset and does
    # a single wrap, which is identical mod 1.  Saves one floor+sub per pixel.
    maxc = jnp.maximum(jnp.maximum(r, g), b)
    minc = jnp.minimum(jnp.minimum(r, g), b)
    eqc = maxc == minc
    cr = maxc - minc
    ones = jnp.ones_like(maxc)
    # Shared approximate reciprocals: EUP slot, effectively free vs. VALU divides.
    # (Small deviation from torchvision's exact divide; fine for augmentation.)
    inv_max = pl.reciprocal(jnp.where(eqc, ones, maxc), approx=True)
    inv_cr = pl.reciprocal(jnp.where(eqc, ones, cr), approx=True)
    s = jnp.minimum(cr * inv_max, 1.0)   # clamp guards approx-reciprocal overshoot
    rc = (maxc - r) * inv_cr
    gc = (maxc - g) * inv_cr
    bc = (maxc - b) * inv_cr
    zeros = jnp.zeros_like(maxc)
    max_is_r = maxc == r
    max_is_g = maxc == g
    not_r = jnp.logical_not(max_is_r)
    hr = jnp.where(max_is_r, bc - gc, zeros)
    hg = jnp.where(max_is_g & not_r, 2.0 + rc - bc, zeros)
    hb = jnp.where(jnp.logical_not(max_is_g) & not_r, 4.0 + gc - rc, zeros)
    h = (hr + hg + hb) * (1.0 / 6.0) + 1.0   # in [5/6, 11/6); caller wraps once
    return h, s, maxc


def _hsv_to_rgb(h, s, v):
    # Mirrors torchvision._hsv2rgb for float tensors (h in [0, 1)).
    h6 = h * 6.0
    i_f = jnp.floor(h6)
    # f is taken before the i_f clamp; only the exact h6 == 6.0 edge would differ,
    # which cannot occur for h in [0, 1) in f32.  Guard kept as a cheap safety net.
    f = h6 - i_f
    i_f = jnp.minimum(i_f, 5.0)          # replaces the % 6 in torchvision
    p = v * (1.0 - s)
    q = v * (1.0 - s * f)
    t = v * (1.0 - s * (1.0 - f))
    # Selector masks computed once and shared across r/g/b:
    # 5 compares + 15 selects instead of 18 compares + 18 selects.
    m0 = i_f == 0.0
    m1 = i_f == 1.0
    m2 = i_f == 2.0
    m3 = i_f == 3.0
    m4 = i_f == 4.0

    def sel(v0, v1, v2, v3, v4, v5):
        out = jnp.where(m4, v4, v5)
        out = jnp.where(m3, v3, out)
        out = jnp.where(m2, v2, out)
        out = jnp.where(m1, v1, out)
        return jnp.where(m0, v0, out)

    r = sel(v, q, p, p, t, v)
    g = sel(t, v, v, q, p, p)
    b = sel(p, p, t, v, v, q)
    return r, g, b


def _jitter_kernel(factors_ref, img_ref, out_ref, *, order, flags, inv_npix):
    """One block = up to `nb` whole images, computed as (nb, S, L) channel slabs.

    factors_ref : SMEM f32[4]  -> [brightness_f, contrast_f, saturation_f, hue_f]
    img_ref     : VMEM f32[nb, 3, S, L]   (L lane-dense: multiple of 128)
    out_ref     : VMEM f32[nb, 3, S, L]
    """
    # Hoisted SMEM scalar reads (read once per kernel invocation).
    bf = factors_ref[0]
    cf = factors_ref[1]
    sf = factors_ref[2]
    hf = factors_ref[3]

    # Channel slabs over the whole block — no per-image unroll.
    r = img_ref[:, 0]
    g = img_ref[:, 1]
    b = img_ref[:, 2]

    for fn_id in order:                      # statically baked order
        if fn_id == 0 and flags[0]:          # brightness
            r = jnp.clip(r * bf, 0.0, 1.0)
            g = jnp.clip(g * bf, 0.0, 1.0)
            b = jnp.clip(b * bf, 0.0, 1.0)
        elif fn_id == 1 and flags[1]:        # contrast
            gray = _GRAY_R * r + _GRAY_G * g + _GRAY_B * b
            # Per-image mean: lane reduce then sublane reduce; divide by the
            # *real* pixel count so spatial padding (zeros) does not bias it.
            row_sum = jnp.sum(gray, axis=-1, keepdims=True)          # (nb, S, 1)
            mean = jnp.sum(row_sum, axis=-2, keepdims=True) * inv_npix  # (nb, 1, 1)
            off = (1.0 - cf) * mean
            r = jnp.clip(cf * r + off, 0.0, 1.0)
            g = jnp.clip(cf * g + off, 0.0, 1.0)
            b = jnp.clip(cf * b + off, 0.0, 1.0)
        elif fn_id == 2 and flags[2]:        # saturation
            gray = _GRAY_R * r + _GRAY_G * g + _GRAY_B * b
            off = (1.0 - sf) * gray
            r = jnp.clip(sf * r + off, 0.0, 1.0)
            g = jnp.clip(sf * g + off, 0.0, 1.0)
            b = jnp.clip(sf * b + off, 0.0, 1.0)
        elif fn_id == 3 and flags[3]:        # hue
            h, s, v = _rgb_to_hsv(r, g, b)
            h = h + hf
            h = h - jnp.floor(h)             # single wrap to [0, 1)
            r, g, b = _hsv_to_rgb(h, s, v)

    out_ref[:, 0] = r.astype(out_ref.dtype)
    out_ref[:, 1] = g.astype(out_ref.dtype)
    out_ref[:, 2] = b.astype(out_ref.dtype)


def _choose_layout(total_pixels):
    """Pick (S, L): L a multiple of 128 (lane-dense stores), minimal padding,
    tie-breaking toward full 8-sublane rows and then wider lanes."""
    best = None
    for lanes in (1024, 512, 256, 128):
        rows = -(-total_pixels // lanes)            # cdiv
        pad = rows * lanes - total_pixels
        ragged = 0 if (rows % 8 == 0 or rows < 8) else 1
        key = (pad, ragged, -min(rows, 8), -lanes)
        if best is None or key < best[0]:
            best = (key, rows, lanes)
    _, rows, lanes = best
    return rows, lanes


def gaussian_color_jitter(img, key, *, brightness=True, contrast=True,
                          saturation=True, hue=True, perm_seed=0):
    """img: f32[N, 3, H, W] in [0, 1]."""
    N, C, H, W = img.shape
    assert C == 3, "color jitter requires RGB images"
    dtype = img.dtype
    T = H * W

    flags = (bool(brightness), bool(contrast), bool(saturation), bool(hue))

    # Random factors ~ N(0, 1), as in the PyTorch module (torch.tensor(1.).normal_()).
    # Negative brightness/contrast/saturation factors would raise in torchvision;
    # here they are applied and clipped (documented divergence).
    factors = jax.random.normal(key, (4,), dtype=jnp.float32)
    if flags[3]:
        # TODO(synk): torchvision raises for |hue_factor| > 0.5; the module would crash
        # there — we clamp instead so the kernel demo always runs.
        factors = factors.at[3].set(jnp.clip(factors[3], -0.5, 0.5))

    # Random application order (torch.randperm(4) in the module), sampled
    # deterministically on host and baked at trace time (fixed across jit calls).
    order = tuple(int(x) for x in np.random.default_rng(perm_seed).permutation(4))

    # Lane-dense layout: flatten H*W, pad up to S*L with L a multiple of 128.
    S, L = _choose_layout(T)
    T_pad = S * L
    x = img.reshape(N, C, T)
    if T_pad != T:
        x = jnp.pad(x, ((0, 0), (0, 0), (0, T_pad - T)))   # zero-pad; mean uses 1/T
    x = x.reshape(N, C, S, L)

    # Block sizing: ~6 MiB per grid step; double-buffered in+out (4x) plus slack
    # stays under a 40 MiB VMEM limit (safe on v7x's 64 MiB physical VMEM, plenty
    # of headroom on v5e/v6e's 128 MiB).  No divisibility requirement on N.
    img_block_bytes = C * T_pad * dtype.itemsize
    BLOCK_BUDGET = 6 << 20
    nb = max(1, min(N, BLOCK_BUDGET // max(img_block_bytes, 1)))
    if N >= 2:
        # Keep >= 2 grid steps so both v7x TensorCores get work (no-op for 1-TC chips).
        nb = max(1, min(nb, pl.cdiv(N, 2)))
    grid = (pl.cdiv(N, nb),)

    block_bytes = nb * img_block_bytes
    vmem_needed = 4 * block_bytes + (4 << 20)   # in + out, double-buffered, + slack
    compiler_kwargs = dict(dimension_semantics=("parallel",))
    if vmem_needed > (16 << 20):
        # Cap well below v7x's 64 MiB physical VMEM to keep compiler headroom.
        compiler_kwargs["vmem_limit_bytes"] = int(min(vmem_needed, 40 << 20))
        # TODO(synk): spatial tiling + two-pass contrast mean for single images whose
        # whole-image double-buffered footprint exceeds ~40 MiB, instead of relying
        # on a larger VMEM limit.

    kernel = functools.partial(_jitter_kernel, order=order, flags=flags,
                               inv_npix=float(1.0 / T))

    out = pl.pallas_call(
        kernel,
        out_shape=jax.ShapeDtypeStruct((N, C, S, L), dtype),
        grid_spec=pltpu.PrefetchScalarGridSpec(
            num_scalar_prefetch=0,
            grid=grid,
            in_specs=[
                pl.BlockSpec(memory_space=pltpu.MemorySpace.SMEM),     # factors f32[4]
                pl.BlockSpec((nb, C, S, L), lambda n: (n, 0, 0, 0)),   # image block
            ],
            out_specs=pl.BlockSpec((nb, C, S, L), lambda n: (n, 0, 0, 0)),
        ),
        compiler_params=pltpu.CompilerParams(**compiler_kwargs),
    )(factors, x)

    out = out.reshape(N, C, T_pad)
    if T_pad != T:
        out = out[:, :, :T]
    return out.reshape(N, C, H, W)


if __name__ == "__main__":
    key = jax.random.PRNGKey(0)
    k_img, k_factors = jax.random.split(key)

    N, C, H, W = 2, 3, 16, 16
    img = jax.random.uniform(k_img, (N, C, H, W), dtype=jnp.float32)  # in [0, 1)

    out = gaussian_color_jitter(img, k_factors,
                                brightness=True, contrast=True,
                                saturation=True, hue=True)
    out = jax.block_until_ready(out)

    assert out.shape == (N, C, H, W) and out.dtype == jnp.float32
    assert bool(jnp.all(jnp.isfinite(out)))
    assert bool(jnp.all(out >= 0.0)) and bool(jnp.all(out <= 1.0))
    print("KERNEL_OK")
</pallas_src>

<mosaic_0001>
module attributes {stable_mosaic.version = 11 : i64} {
  func.func @_jitter_kernel(%arg0: i32, %arg1: memref<4xf32, #tpu.memory_space<smem>>, %arg2: memref<1x3x2x128xf32, #tpu.memory_space<vmem>>, %arg3: memref<1x3x2x128xf32, #tpu.memory_space<vmem>>) attributes {dimension_semantics = [#tpu.dimension_semantics<parallel>], iteration_bounds = array<i64: 2>, scalar_prefetch = 0 : i64, scratch_operands = 0 : i64, tpu.core_type = #tpu.core_type<tc>, window_params = [{transform_indices = @transform_0, window_bounds = array<i64: 4>}, {transform_indices = @transform_1, window_bounds = array<i64: 1, 3, 2, 128>}, {transform_indices = @transform_2, window_bounds = array<i64: 1, 3, 2, 128>}]} {
    %c0 = arith.constant 0 : index
    %0 = memref.load %arg1[%c0] : memref<4xf32, #tpu.memory_space<smem>>
    %c1 = arith.constant 1 : index
    %1 = memref.load %arg1[%c1] : memref<4xf32, #tpu.memory_space<smem>>
    %c2 = arith.constant 2 : index
    %2 = memref.load %arg1[%c2] : memref<4xf32, #tpu.memory_space<smem>>
    %c3 = arith.constant 3 : index
    %3 = memref.load %arg1[%c3] : memref<4xf32, #tpu.memory_space<smem>>
    %c0_0 = arith.constant 0 : index
    %c0_1 = arith.constant 0 : index
    %c0_2 = arith.constant 0 : index
    %c0_3 = arith.constant 0 : index
    %4 = vector.load %arg2[%c0_0, %c0_1, %c0_2, %c0_3] : memref<1x3x2x128xf32, #tpu.memory_space<vmem>>, vector<1x1x2x128xf32>
    %5 = vector.shape_cast %4 : vector<1x1x2x128xf32> to vector<1x2x128xf32>
    %c0_4 = arith.constant 0 : index
    %c1_5 = arith.constant 1 : index
    %c0_6 = arith.constant 0 : index
    %c0_7 = arith.constant 0 : index
    %6 = vector.load %arg2[%c0_4, %c1_5, %c0_6, %c0_7] : memref<1x3x2x128xf32, #tpu.memory_space<vmem>>, vector<1x1x2x128xf32>
    %7 = vector.shape_cast %6 : vector<1x1x2x128xf32> to vector<1x2x128xf32>
    %c0_8 = arith.constant 0 : index
    %c2_9 = arith.constant 2 : index
    %c0_10 = arith.constant 0 : index
    %c0_11 = arith.constant 0 : index
    %8 = vector.load %arg2[%c0_8, %c2_9, %c0_10, %c0_11] : memref<1x3x2x128xf32, #tpu.memory_space<vmem>>, vector<1x1x2x128xf32>
    %9 = vector.shape_cast %8 : vector<1x1x2x128xf32> to vector<1x2x128xf32>
    %cst = arith.constant 2.989000e-01 : f32
    %10 = vector.broadcast %cst : f32 to vector<1x2x128xf32>
    %11 = arith.mulf %10, %5 : vector<1x2x128xf32>
    %cst_12 = arith.constant 5.870000e-01 : f32
    %12 = vector.broadcast %cst_12 : f32 to vector<1x2x128xf32>
    %13 = arith.mulf %12, %7 : vector<1x2x128xf32>
    %14 = arith.addf %11, %13 : vector<1x2x128xf32>
    %cst_13 = arith.constant 1.140000e-01 : f32
    %15 = vector.broadcast %cst_13 : f32 to vector<1x2x128xf32>
    %16 = arith.mulf %15, %9 : vector<1x2x128xf32>
    %17 = arith.addf %14, %16 : vector<1x2x128xf32>
    %cst_14 = arith.constant 1.000000e+00 : f32
    %18 = arith.subf %cst_14, %2 : f32
    %19 = vector.broadcast %18 : f32 to vector<1x2x128xf32>
    %20 = arith.mulf %19, %17 : vector<1x2x128xf32>
    %21 = vector.broadcast %2 : f32 to vector<1x2x128xf32>
    %22 = arith.mulf %21, %5 : vector<1x2x128xf32>
    %23 = arith.addf %22, %20 : vector<1x2x128xf32>
    %cst_15 = arith.constant 0.000000e+00 : f32
    %cst_16 = arith.constant 1.000000e+00 : f32
    %24 = vector.broadcast %cst_15 : f32 to vector<1x2x128xf32>
    %25 = arith.maximumf %24, %23 : vector<1x2x128xf32>
    %26 = vector.broadcast %cst_16 : f32 to vector<1x2x128xf32>
    %27 = arith.minimumf %26, %25 : vector<1x2x128xf32>
    %28 = vector.broadcast %2 : f32 to vector<1x2x128xf32>
    %29 = arith.mulf %28, %7 : vector<1x2x128xf32>
    %30 = arith.addf %29, %20 : vector<1x2x128xf32>
    %cst_17 = arith.constant 0.000000e+00 : f32
    %cst_18 = arith.constant 1.000000e+00 : f32
    %31 = vector.broadcast %cst_17 : f32 to vector<1x2x128xf32>
    %32 = arith.maximumf %31, %30 : vector<1x2x128xf32>
    %33 = vector.broadcast %cst_18 : f32 to vector<1x2x128xf32>
    %34 = arith.minimumf %33, %32 : vector<1x2x128xf32>
    %35 = vector.broadcast %2 : f32 to vector<1x2x128xf32>
    %36 = arith.mulf %35, %9 : vector<1x2x128xf32>
    %37 = arith.addf %36, %20 : vector<1x2x128xf32>
    %cst_19 = arith.constant 0.000000e+00 : f32
    %cst_20 = arith.constant 1.000000e+00 : f32
    %38 = vector.broadcast %cst_19 : f32 to vector<1x2x128xf32>
    %39 = arith.maximumf %38, %37 : vector<1x2x128xf32>
    %40 = vector.broadcast %cst_20 : f32 to vector<1x2x128xf32>
    %41 = arith.minimumf %40, %39 : vector<1x2x128xf32>
    %42 = vector.broadcast %0 : f32 to vector<1x2x128xf32>
    %43 = arith.mulf %27, %42 : vector<1x2x128xf32>
    %cst_21 = arith.constant 0.000000e+00 : f32
    %cst_22 = arith.constant 1.000000e+00 : f32
    %44 = vector.broadcast %cst_21 : f32 to vector<1x2x128xf32>
    %45 = arith.maximumf %44, %43 : vector<1x2x128xf32>
    %46 = vector.broadcast %cst_22 : f32 to vector<1x2x128xf32>
    %47 = arith.minimumf %46, %45 : vector<1x2x128xf32>
    %48 = vector.broadcast %0 : f32 to vector<1x2x128xf32>
    %49 = arith.mulf %34, %48 : vector<1x2x128xf32>
    %cst_23 = arith.constant 0.000000e+00 : f32
    %cst_24 = arith.constant 1.000000e+00 : f32
    %50 = vector.broadcast %cst_23 : f32 to vector<1x2x128xf32>
    %51 = arith.maximumf %50, %49 : vector<1x2x128xf32>
    %52 = vector.broadcast %cst_24 : f32 to vector<1x2x128xf32>
    %53 = arith.minimumf %52, %51 : vector<1x2x128xf32>
    %54 = vector.broadcast %0 : f32 to vector<1x2x128xf32>
    %55 = arith.mulf %41, %54 : vector<1x2x128xf32>
    %cst_25 = arith.constant 0.000000e+00 : f32
    %cst_26 = arith.constant 1.000000e+00 : f32
    %56 = vector.broadcast %cst_25 : f32 to vector<1x2x128xf32>
    %57 = arith.maximumf %56, %55 : vector<1x2x128xf32>
    %58 = vector.broadcast %cst_26 : f32 to vector<1x2x128xf32>
    %59 = arith.minimumf %58, %57 : vector<1x2x128xf32>
    %cst_27 = arith.constant 2.989000e-01 : f32
    %60 = vector.broadcast %cst_27 : f32 to vector<1x2x128xf32>
    %61 = arith.mulf %60, %47 : vector<1x2x128xf32>
    %cst_28 = arith.constant 5.870000e-01 : f32
    %62 = vector.broadcast %cst_28 : f32 to vector<1x2x128xf32>
    %63 = arith.mulf %62, %53 : vector<1x2x128xf32>
    %64 = arith.addf %61, %63 : vector<1x2x128xf32>
    %cst_29 = arith.constant 1.140000e-01 : f32
    %65 = vector.broadcast %cst_29 : f32 to vector<1x2x128xf32>
    %66 = arith.mulf %65, %59 : vector<1x2x128xf32>
    %67 = arith.addf %64, %66 : vector<1x2x128xf32>
    %cst_30 = arith.constant dense<0.000000e+00> : vector<1x2xf32>
    %68 = vector.multi_reduction <add>, %67, %cst_30 [2] : vector<1x2x128xf32> to vector<1x2xf32>
    %69 = vector.shape_cast %68 : vector<1x2xf32> to vector<1x2x1xf32>
    %cst_31 = arith.constant dense<0.000000e+00> : vector<1x1xf32>
    %70 = vector.multi_reduction <add>, %69, %cst_31 [1] : vector<1x2x1xf32> to vector<1x1xf32>
    %71 = vector.shape_cast %70 : vector<1x1xf32> to vector<1x1x1xf32>
    %cst_32 = arith.constant 3.906250e-03 : f32
    %72 = vector.broadcast %cst_32 : f32 to vector<1x1x1xf32>
    %73 = arith.mulf %71, %72 : vector<1x1x1xf32>
    %cst_33 = arith.constant 1.000000e+00 : f32
    %74 = arith.subf %cst_33, %1 : f32
    %75 = vector.broadcast %74 : f32 to vector<1x1x1xf32>
    %76 = arith.mulf %75, %73 : vector<1x1x1xf32>
    %77 = vector.broadcast %1 : f32 to vector<1x2x128xf32>
    %78 = arith.mulf %77, %47 : vector<1x2x128xf32>
    %79 = vector.broadcast %76 : vector<1x1x1xf32> to vector<1x2x128xf32>
    %80 = arith.addf %78, %79 : vector<1x2x128xf32>
    %cst_34 = arith.constant 0.000000e+00 : f32
    %cst_35 = arith.constant 1.000000e+00 : f32
    %81 = vector.broadcast %cst_34 : f32 to vector<1x2x128xf32>
    %82 = arith.maximumf %81, %80 : vector<1x2x128xf32>
    %83 = vector.broadcast %cst_35 : f32 to vector<1x2x128xf32>
    %84 = arith.minimumf %83, %82 : vector<1x2x128xf32>
    %85 = vector.broadcast %1 : f32 to vector<1x2x128xf32>
    %86 = arith.mulf %85, %53 : vector<1x2x128xf32>
    %87 = vector.broadcast %76 : vector<1x1x1xf32> to vector<1x2x128xf32>
    %88 = arith.addf %86, %87 : vector<1x2x128xf32>
    %cst_36 = arith.constant 0.000000e+00 : f32
    %cst_37 = arith.constant 1.000000e+00 : f32
    %89 = vector.broadcast %cst_36 : f32 to vector<1x2x128xf32>
    %90 = arith.maximumf %89, %88 : vector<1x2x128xf32>
    %91 = vector.broadcast %cst_37 : f32 to vector<1x2x128xf32>
    %92 = arith.minimumf %91, %90 : vector<1x2x128xf32>
    %93 = vector.broadcast %1 : f32 to vector<1x2x128xf32>
    %94 = arith.mulf %93, %59 : vector<1x2x128xf32>
    %95 = vector.broadcast %76 : vector<1x1x1xf32> to vector<1x2x128xf32>
    %96 = arith.addf %94, %95 : vector<1x2x128xf32>
    %cst_38 = arith.constant 0.000000e+00 : f32
    %cst_39 = arith.constant 1.000000e+00 : f32
    %97 = vector.broadcast %cst_38 : f32 to vector<1x2x128xf32>
    %98 = arith.maximumf %97, %96 : vector<1x2x128xf32>
    %99 = vector.broadcast %cst_39 : f32 to vector<1x2x128xf32>
    %100 = arith.minimumf %99, %98 : vector<1x2x128xf32>
    %101 = arith.maximumf %84, %92 : vector<1x2x128xf32>
    %102 = arith.maximumf %101, %100 : vector<1x2x128xf32>
    %103 = arith.minimumf %84, %92 : vector<1x2x128xf32>
    %104 = arith.minimumf %103, %100 : vector<1x2x128xf32>
    %105 = arith.cmpf oeq, %102, %104 : vector<1x2x128xf32>
    %106 = arith.subf %102, %104 : vector<1x2x128xf32>
    %cst_40 = arith.constant 1.000000e+00 : f32
    %107 = vector.broadcast %cst_40 : f32 to vector<1x2x128xf32>
    %108 = arith.select %105, %107, %102 : vector<1x2x128xi1>, vector<1x2x128xf32>
    %109 = tpu.reciprocal %108 {approx = true} : vector<1x2x128xf32> -> vector<1x2x128xf32>
    %110 = arith.select %105, %107, %106 : vector<1x2x128xi1>, vector<1x2x128xf32>
    %111 = tpu.reciprocal %110 {approx = true} : vector<1x2x128xf32> -> vector<1x2x128xf32>
    %112 = arith.mulf %106, %109 : vector<1x2x128xf32>
    %cst_41 = arith.constant 1.000000e+00 : f32
    %113 = vector.broadcast %cst_41 : f32 to vector<1x2x128xf32>
    %114 = arith.minimumf %112, %113 : vector<1x2x128xf32>
    %115 = arith.subf %102, %84 : vector<1x2x128xf32>
    %116 = arith.mulf %115, %111 : vector<1x2x128xf32>
    %117 = arith.subf %102, %92 : vector<1x2x128xf32>
    %118 = arith.mulf %117, %111 : vector<1x2x128xf32>
    %119 = arith.subf %102, %100 : vector<1x2x128xf32>
    %120 = arith.mulf %119, %111 : vector<1x2x128xf32>
    %cst_42 = arith.constant 0.000000e+00 : f32
    %121 = vector.broadcast %cst_42 : f32 to vector<1x2x128xf32>
    %122 = arith.cmpf oeq, %102, %84 : vector<1x2x128xf32>
    %123 = arith.cmpf oeq, %102, %92 : vector<1x2x128xf32>
    %cst_43 = arith.constant dense<true> : vector<1x2x128xi1>
    %124 = arith.xori %122, %cst_43 : vector<1x2x128xi1>
    %125 = arith.subf %120, %118 : vector<1x2x128xf32>
    %126 = arith.select %122, %125, %121 : vector<1x2x128xi1>, vector<1x2x128xf32>
    %127 = arith.andi %123, %124 : vector<1x2x128xi1>
    %cst_44 = arith.constant 2.000000e+00 : f32
    %128 = vector.broadcast %cst_44 : f32 to vector<1x2x128xf32>
    %129 = arith.addf %128, %116 : vector<1x2x128xf32>
    %130 = arith.subf %129, %120 : vector<1x2x128xf32>
    %131 = arith.select %127, %130, %121 : vector<1x2x128xi1>, vector<1x2x128xf32>
    %cst_45 = arith.constant dense<true> : vector<1x2x128xi1>
    %132 = arith.xori %123, %cst_45 : vector<1x2x128xi1>
    %133 = arith.andi %132, %124 : vector<1x2x128xi1>
    %cst_46 = arith.constant 4.000000e+00 : f32
    %134 = vector.broadcast %cst_46 : f32 to vector<1x2x128xf32>
    %135 = arith.addf %134, %118 : vector<1x2x128xf32>
    %136 = arith.subf %135, %116 : vector<1x2x128xf32>
    %137 = arith.select %133, %136, %121 : vector<1x2x128xi1>, vector<1x2x128xf32>
    %138 = arith.addf %126, %131 : vector<1x2x128xf32>
    %139 = arith.addf %138, %137 : vector<1x2x128xf32>
    %cst_47 = arith.constant 0.166666672 : f32
    %140 = vector.broadcast %cst_47 : f32 to vector<1x2x128xf32>
    %141 = arith.mulf %139, %140 : vector<1x2x128xf32>
    %cst_48 = arith.constant 1.000000e+00 : f32
    %142 = vector.broadcast %cst_48 : f32 to vector<1x2x128xf32>
    %143 = arith.addf %141, %142 : vector<1x2x128xf32>
    %144 = vector.broadcast %3 : f32 to vector<1x2x128xf32>
    %145 = arith.addf %143, %144 : vector<1x2x128xf32>
    %146 = math.floor %145 : vector<1x2x128xf32>
    %147 = arith.subf %145, %146 : vector<1x2x128xf32>
    %cst_49 = arith.constant 6.000000e+00 : f32
    %148 = vector.broadcast %cst_49 : f32 to vector<1x2x128xf32>
    %149 = arith.mulf %147, %148 : vector<1x2x128xf32>
    %150 = math.floor %149 : vector<1x2x128xf32>
    %151 = arith.subf %149, %150 : vector<1x2x128xf32>
    %cst_50 = arith.constant 5.000000e+00 : f32
    %152 = vector.broadcast %cst_50 : f32 to vector<1x2x128xf32>
    %153 = arith.minimumf %150, %152 : vector<1x2x128xf32>
    %cst_51 = arith.constant 1.000000e+00 : f32
    %154 = vector.broadcast %cst_51 : f32 to vector<1x2x128xf32>
    %155 = arith.subf %154, %114 : vector<1x2x128xf32>
    %156 = arith.mulf %102, %155 : vector<1x2x128xf32>
    %157 = arith.mulf %114, %151 : vector<1x2x128xf32>
    %cst_52 = arith.constant 1.000000e+00 : f32
    %158 = vector.broadcast %cst_52 : f32 to vector<1x2x128xf32>
    %159 = arith.subf %158, %157 : vector<1x2x128xf32>
    %160 = arith.mulf %102, %159 : vector<1x2x128xf32>
    %cst_53 = arith.constant 1.000000e+00 : f32
    %161 = vector.broadcast %cst_53 : f32 to vector<1x2x128xf32>
    %162 = arith.subf %161, %151 : vector<1x2x128xf32>
    %163 = arith.mulf %114, %162 : vector<1x2x128xf32>
    %cst_54 = arith.constant 1.000000e+00 : f32
    %164 = vector.broadcast %cst_54 : f32 to vector<1x2x128xf32>
    %165 = arith.subf %164, %163 : vector<1x2x128xf32>
    %166 = arith.mulf %102, %165 : vector<1x2x128xf32>
    %cst_55 = arith.constant 0.000000e+00 : f32
    %167 = vector.broadcast %cst_55 : f32 to vector<1x2x128xf32>
    %168 = arith.cmpf oeq, %153, %167 : vector<1x2x128xf32>
    %cst_56 = arith.constant 1.000000e+00 : f32
    %169 = vector.broadcast %cst_56 : f32 to vector<1x2x128xf32>
    %170 = arith.cmpf oeq, %153, %169 : vector<1x2x128xf32>
    %cst_57 = arith.constant 2.000000e+00 : f32
    %171 = vector.broadcast %cst_57 : f32 to vector<1x2x128xf32>
    %172 = arith.cmpf oeq, %153, %171 : vector<1x2x128xf32>
    %cst_58 = arith.constant 3.000000e+00 : f32
    %173 = vector.broadcast %cst_58 : f32 to vector<1x2x128xf32>
    %174 = arith.cmpf oeq, %153, %173 : vector<1x2x128xf32>
    %cst_59 = arith.constant 4.000000e+00 : f32
    %175 = vector.broadcast %cst_59 : f32 to vector<1x2x128xf32>
    %176 = arith.cmpf oeq, %153, %175 : vector<1x2x128xf32>
    %177 = arith.select %176, %166, %102 : vector<1x2x128xi1>, vector<1x2x128xf32>
    %178 = arith.select %174, %156, %177 : vector<1x2x128xi1>, vector<1x2x128xf32>
    %179 = arith.select %172, %156, %178 : vector<1x2x128xi1>, vector<1x2x128xf32>
    %180 = arith.select %170, %160, %179 : vector<1x2x128xi1>, vector<1x2x128xf32>
    %181 = arith.select %168, %102, %180 : vector<1x2x128xi1>, vector<1x2x128xf32>
    %182 = arith.select %176, %156, %156 : vector<1x2x128xi1>, vector<1x2x128xf32>
    %183 = arith.select %174, %160, %182 : vector<1x2x128xi1>, vector<1x2x128xf32>
    %184 = arith.select %172, %102, %183 : vector<1x2x128xi1>, vector<1x2x128xf32>
    %185 = arith.select %170, %102, %184 : vector<1x2x128xi1>, vector<1x2x128xf32>
    %186 = arith.select %168, %166, %185 : vector<1x2x128xi1>, vector<1x2x128xf32>
    %187 = arith.select %176, %102, %160 : vector<1x2x128xi1>, vector<1x2x128xf32>
    %188 = arith.select %174, %102, %187 : vector<1x2x128xi1>, vector<1x2x128xf32>
    %189 = arith.select %172, %166, %188 : vector<1x2x128xi1>, vector<1x2x128xf32>
    %190 = arith.select %170, %156, %189 : vector<1x2x128xi1>, vector<1x2x128xf32>
    %191 = arith.select %168, %156, %190 : vector<1x2x128xi1>, vector<1x2x128xf32>
    %c0_60 = arith.constant 0 : index
    %c0_61 = arith.constant 0 : index
    %c0_62 = arith.constant 0 : index
    %c0_63 = arith.constant 0 : index
    %192 = vector.load %arg3[%c0_60, %c0_61, %c0_62, %c0_63] : memref<1x3x2x128xf32, #tpu.memory_space<vmem>>, vector<1x1x2x128xf32>
    %193 = vector.shape_cast %192 : vector<1x1x2x128xf32> to vector<1x2x128xf32>
    %194 = vector.shape_cast %181 : vector<1x2x128xf32> to vector<1x1x2x128xf32>
    tpu.vector_store %arg3[%c0_60, %c0_61, %c0_62, %c0_63], %194 {strides = array<i32>} : memref<1x3x2x128xf32, #tpu.memory_space<vmem>>, vector<1x1x2x128xf32>,
    %c0_64 = arith.constant 0 : index
    %c1_65 = arith.constant 1 : index
    %c0_66 = arith.constant 0 : index
    %c0_67 = arith.constant 0 : index
    %195 = vector.load %arg3[%c0_64, %c1_65, %c0_66, %c0_67] : memref<1x3x2x128xf32, #tpu.memory_space<vmem>>, vector<1x1x2x128xf32>
    %196 = vector.shape_cast %195 : vector<1x1x2x128xf32> to vector<1x2x128xf32>
    %197 = vector.shape_cast %186 : vector<1x2x128xf32> to vector<1x1x2x128xf32>
    tpu.vector_store %arg3[%c0_64, %c1_65, %c0_66, %c0_67], %197 {strides = array<i32>} : memref<1x3x2x128xf32, #tpu.memory_space<vmem>>, vector<1x1x2x128xf32>,
    %c0_68 = arith.constant 0 : index
    %c2_69 = arith.constant 2 : index
    %c0_70 = arith.constant 0 : index
    %c0_71 = arith.constant 0 : index
    %198 = vector.load %arg3[%c0_68, %c2_69, %c0_70, %c0_71] : memref<1x3x2x128xf32, #tpu.memory_space<vmem>>, vector<1x1x2x128xf32>
    %199 = vector.shape_cast %198 : vector<1x1x2x128xf32> to vector<1x2x128xf32>
    %200 = vector.shape_cast %191 : vector<1x2x128xf32> to vector<1x1x2x128xf32>
    tpu.vector_store %arg3[%c0_68, %c2_69, %c0_70, %c0_71], %200 {strides = array<i32>} : memref<1x3x2x128xf32, #tpu.memory_space<vmem>>, vector<1x1x2x128xf32>,
    return
  }
  func.func @transform_0(%arg0: i32) -> i32 {
    %c0_i32 = arith.constant 0 : i32
    %c0_i32_0 = arith.constant 0 : i32
    return %c0_i32 : i32
  }
  func.func @transform_1(%arg0: i32) -> (i32, i32, i32, i32) {
    %c0_i32 = arith.constant 0 : i32
    %c0_i32_0 = arith.constant 0 : i32
    %c0_i32_1 = arith.constant 0 : i32
    %c0_i32_2 = arith.constant 0 : i32
    return %arg0, %c0_i32, %c0_i32_0, %c0_i32_1 : i32, i32, i32, i32
  }
  func.func @transform_2(%arg0: i32) -> (i32, i32, i32, i32) {
    %c0_i32 = arith.constant 0 : i32
    %c0_i32_0 = arith.constant 0 : i32
    %c0_i32_1 = arith.constant 0 : i32
    %c0_i32_2 = arith.constant 0 : i32
    return %arg0, %c0_i32, %c0_i32_0, %c0_i32_1 : i32, i32, i32, i32
  }
}

</mosaic_0001>

<bundles_post_ra>
// kernel: tpu_custom_call.1
= control target key start
LH: loop header
LB: loop body
LE: loop exit
PB: predicated region body
PF: predicated region fallthrough
CT: control target
= control target key end

     0   :  { %7 = vsyncpa [#allocation5], 0  ;;  %s902_s0 = inlined_call_operand.hbm [shape: f32[4], index: 0, kind: input, shape index: {}]   ;;  %s903_s1 = inlined_call_operand.hbm [shape: f32[2,3,2,128], index: 1, kind: input, shape index: {}]   ;;  %s904_s2 = inlined_call_operand.hbm [shape: f32[2,3,2,128], index: 2, kind: output, shape index: {}]  }
   0x1   :  { %8 = vsyncpa [#allocation3], 0 }
   0x2   :  { %10 = vsyncpa [#allocation3 + $0x1], 0 }
   0x3   :  { %11 = vsyncpa [#allocation4], 0 }
   0x4   :  { %13 = vsyncpa [#allocation4 + $0x1], 0  ;;  %s648_s9 = smov 0   ;;  %s650_s10 = smov 0  }
   0x5   :  { %s652_s11 = smov 0   ;;  %s654_s12 = smov 0  }
   0x6 LB: > { %s669_s13 = sadd.s32 4294967295, %s623_s12   ;;  %s423_s14 = sadd.s32 4294967294, %s623_s12   ;;  %s623_s12 = sphi %s654_s12, %s930_s12   ;;  %s619_s11 = sphi %s652_s11, %s929_s11   ;;  %s615_s10 = sphi %s650_s10, %s928_s10   ;;  %s611_s9 = sphi %s648_s9, %s927_s9  }
   0x7   : > { %s673_s15 = sadd.s32 1, %s623_s12   ;;  %s47_s16 = sadd.s32 1, %s619_s11 }
   0x8   : > { %s44_s17 = ssub.s32 %s623_s12, %s673_s15  ;;  %p54_p0 = scmp.ne.s32.totalorder %s619_s11, %s615_s10 }
   0x9   : > { %p45_p1 = scmp.eq.s32.totalorder %s44_s17, 0  ;;  %p55_p2 = scmp.eq.s32.totalorder %s623_s12, 0 }
   0xa   : > { %p60_p3 = scmp.ne.s32.totalorder %s615_s10, %s611_s9  ;;  %p905_p4 = scmp.eq.s32.totalorder %s669_s13, 0 }
   0xb   : > { %s685_s18 = scalar_select %p45_p1, %s619_s11, %s47_s16  }
   0xc   : > { %p687_p5 = por %p55_p2, %p54_p0  ;;  %p693_p6 = por %p905_p4, %p60_p3 }
   0xd   : > { %p84_p7 = scmp.eq.s32.totalorder %s669_s13, 1  ;;  %p90_p8 = scmp.eq.s32.totalorder %s423_s14, 1 }
   0xe   : > { %s909_s20 = scalar_select %p693_p6, 1, 0 }
   0xf   : > { %p424_p9 = scmp.ge.s32.totalorder %s623_s12, 1  ;;  %p97_p10 = scmp.lt.s32.totalorder %s623_s12, 3 }
  0x10   : > { %p700_p11 = por %p84_p7, %p54_p0  ;;  %p704_p12 = por %p90_p8, %p60_p3 }
  0x11   : > { %p708_p13 = pnand %p424_p9, %p97_p10  ;;  %p465_p4 = scmp.lt.s32.totalorder %s623_s12, 2 }
  0x12   : > { %s910_s21 = scalar_select %p700_p11, 1, 0 }
  0x13   : > { %s911_s22 = scalar_select %p704_p12, 1, 0 }
  0x14   : > { %p452_p2 = pneg %p708_p13  ;;  %s119_s24 = sand.u32 1, %s619_s11  }
  0x15   : > { %s441_s25 = smul.u32 96, %s623_s12  ;;  %p913_p6 = scmp.eq.s32.totalorder %s669_s13, 0 }
  0x16   : > { %p722_p7 = pnand %p465_p4, %p687_p5  ;;  %s440_s27 = smul.u32 6, %s119_s24 }
  0x17   : > { %p453_p0 = pnand %p452_p2, %p913_p6  ;;  %s510_s30 = scalar_lea.hbm %s902_s0, 16 }
  0x18   : > { %p511_p3 = scmp.ne.s32.totalorder %s902_s0, %s510_s30  ;;  %p517_p6 = scmp.lt.u32.totalorder %s510_s30, %s902_s0 }
  0x19   : > { %p512_p8 = pneg %p453_p0 }
  0x1b   : > { %p513_p9 = pnand %p512_p8, %p511_p3 }
  0x1d   : > { %p514_p10 = pneg %p513_p9 }
  0x1f   : > { %p519_p4 = pnand %p517_p6, %p514_p10 }
  0x21   : > { %522 = shalt.err (!%p519_p4)
}
  0x22   : > { %s625_s7 = smov [#allocation2]   ;;  %s741_s19 = scalar_lea.hbm %s903_s1, %s441_s25 }
  0x23   : > { %455 = dma.hbm_to_smem (!%p453_p0), %s902_s0, 16, %s625_s7, [#allocation5]  }
  0x24   : > { %s123_s28 = scalar_lea.vmem [#allocation6], %s440_s27  ;;  %s745_s30 = scalar_lea.sflag [#allocation3], %s119_s24 }
  0x25   : > { %s130_s29 = sshll.u32 %s123_s28, 4  ;;  %s523_s3 = scalar_lea.hbm %s741_s19, 96  ;;  %s743_s29 = int_to_ptr.vmem [resolvable:$true] %s130_s29 }
  0x26   : > { %p524_p5 = scmp.ne.s32.totalorder %s741_s19, %s523_s3  ;;  %p525_p2 = pneg %p722_p7 }
  0x27   : > { %s528_s5 = scalar_lea.hbm %s903_s1, 192  ;;  %p529_p8 = scmp.lt.u32.totalorder %s741_s19, %s903_s1 }
  0x28   : > { %p526_p0 = pnand %p525_p2, %p524_p5  ;;  %p530_p9 = scmp.lt.u32.totalorder %s528_s5, %s523_s3 }
  0x29   : > { %p532_p6 = scmp.lt.u32.totalorder %s523_s3, %s741_s19 }
  0x2a   : > { %p527_p3 = pneg %p526_p0  ;;  %p531_p10 = por %p530_p9, %p529_p8 }
  0x2c   : > { %p533_p4 = por %p532_p6, %p531_p10 }
  0x2e   : > { %p534_p1 = pnand %p533_p4, %p527_p3 }
  0x30   : > { %537 = shalt.err (!%p534_p1)
}
  0x31   : > { %s538_s24 = scalar_lea.vmem %s743_s29, 96  ;;  %s626_s27 = smov [#allocation6]  }
  0x32   : > { %p539_p5 = scmp.ne.s32.totalorder %s743_s29, %s538_s24  ;;  %s543_s8 = sshll.u32 %s626_s27, 4  ;;  %s544_s8 = int_to_ptr.vmem [resolvable:$false] %s543_s8 }
  0x33   : > { %s545_s14 = scalar_lea.vmem %s544_s8, 192  ;;  %p546_p11 = scmp.lt.s32.totalorder %s743_s29, %s544_s8 }
  0x34   : > { %p541_p0 = pnand %p539_p5, %p525_p2  ;;  %p547_p8 = scmp.lt.s32.totalorder %s545_s14, %s538_s24 }
  0x36   : > { %p542_p12 = pneg %p541_p0  ;;  %p548_p9 = por %p547_p8, %p546_p11 }
  0x38   : > { %p549_p10 = pnand %p548_p9, %p542_p12 }
  0x3a   : > { %552 = shalt.err (!%p549_p10)
}
  0x3b   : > { %s627_s16 = smov 32   ;;  %s628_s17 = smov 2  }
  0x3c   : > { %459 = dma.hbm_to_vmem [thread:$0]  (!%p722_p7), %s741_s19, 96, %s743_s29, %s745_s30, %s627_s16, %s627_s16, %s628_s17  }
  0x3d   : > { %142 = sbr.rel (%p708_p13) target bundleno = 344 (0x158), region = 28  ;;  %p915_p1 = scmp.eq.s32.totalorder (!%p708_p13), %s669_s13, 0 }
  0x44   : > { %598 = dma.done.wait (%p915_p1), [#allocation5], 16   ;;  %p916_p2 = pmov %p915_p1 }
  0x45   : > { %s780_s28 = sand.u32 1, %s615_s10   ;;  %p917_p11 = scmp.ne.s32.totalorder %s909_s20, 0 }
  0x46   : > { %600 = vsyncadd (%p916_p2), [#allocation5], 4294967280  ;;  %s442_s3 = smul.u32 6, %s780_s28  ;;  %s149_s25 = scalar_lea.sflag [#allocation3], %s780_s28 }
  0x48   : > { %s152_s26 = scalar_lea.vmem [#allocation6], %s442_s3 }
  0x49   : > { %602 = dma.done.wait (%p917_p11), %s149_s25, 96  }
  0x4a   : > { %604 = vsyncadd (%p917_p11), %s149_s25, 4294967200 }
  0x4b   : > { %157 = sfence }
  0x4c   : > { %v178_v0 = vld [vmem:[%s152_s26] sm:$0x3]  ;;  %s431_s23 = sld [smem:[#allocation2 + $0x2]]  ;;  %v433_v1 = vld [vmem:[%s152_s26 + $0x2] sm:$0x3]  ;;  %s174_s19 = sld [smem:[#allocation2]] }
  0x4d   : > { %v434_v2 = vld [vmem:[%s152_s26 + $0x4] sm:$0x3]  ;;  %v183_v3 = vmul.f32 0.2989, %v178_v0  ;;  %v184_v4 = vmul.f32 0.587, %v433_v1 }
  0x4e   : > { %v186_v5 = vmul.f32 0.114, %v434_v2  ;;  %vm219_vm0 = vcmask 1041408   ;;  %s430_s20 = sld [smem:[#allocation2 + $0x1]]  ;;  %vm629_vm4 = vmmov 1   ;;  %s432_s4 = sld [smem:[#allocation2 + $0x3]] }
  0x4f   : > { %v185_v6 = vadd.f32 %v184_v4, %v183_v3  ;;  %s443_s5 = smul.u32 96, %s669_s13  ;;  %s173_s6 = scalar_lea.vmem [#allocation7], %s442_s3 }
  0x50   : > { %s338_s7 = sshll.u32 %s173_s6, 4  ;;  %s325_s8 = scalar_lea.sflag [#allocation4], %s780_s28  ;;  %s856_s7 = int_to_ptr.vmem [resolvable:$true] %s338_s7 }
  0x51   : > { %v187_v7 = vadd.f32 %v186_v5, %v185_v6  ;;  %s853_s27 = scalar_lea.hbm %s904_s2, %s443_s5  ;;  %s553_s14 = scalar_lea.vmem %s856_s7, 96 }
  0x52   : > { %s188_s29 = ssub.f32 1.0, %s431_s23  ;;  %v191_v8 = vstv %s431_s23  ;;  %v204_v20 = vstv %s174_s19  ;;  %p554_p12 = scmp.ne.s32.totalorder %s856_s7, %s553_s14 }
  0x53   : > { %v192_v9 = vmul.f32 %v191_v8, %v178_v0  ;;  %v196_v10 = vmul.f32 %v433_v1, %v191_v8  ;;  %v200_v11 = vmul.f32 %v434_v2, %v191_v8  ;;  %p924_p13 = scmp.ne.s32.totalorder %s910_s21, 0  ;;  %s630_s16 = smov [#allocation7]  }
  0x54   : > { %v189_v12 = vstv %s188_s29  ;;  %s231_s30 = ssub.f32 1.0, %s430_s20  ;;  %v234_v46 = vstv %s430_s20  ;;  %s557_s17 = sshll.u32 %s630_s16, 4  ;;  %s558_s17 = int_to_ptr.vmem [resolvable:$false] %s557_s17 }
  0x55   : > { %v190_v13 = vmul.f32 %v189_v12, %v187_v7  ;;  %p555_p7 = pnand %p554_p12, %p924_p13  ;;  %s559_s3 = scalar_lea.vmem %s558_s17, 192 }
  0x56   : > { %v232_v48 = vstv %s231_s30  ;;  %p560_p6 = scmp.lt.s32.totalorder %s856_s7, %s558_s17  ;;  %p561_p4 = scmp.lt.s32.totalorder %s559_s3, %s553_s14 }
  0x57   : > { %v193_v14 = vadd.f32 %v192_v9, %v190_v13  ;;  %v197_v15 = vadd.f32 %v196_v10, %v190_v13  ;;  %v201_v16 = vadd.f32 %v200_v11, %v190_v13  ;;  %p556_p3 = pneg %p555_p7 }
  0x58   : > { %p562_p5 = por %p561_p4, %p560_p6 }
  0x59   : > { %v194_v17 = vmax.f32 %v193_v14, 0.0  ;;  %v198_v18 = vmax.f32 %v197_v15, 0.0  ;;  %v202_v19 = vmax.f32 %v201_v16, 0.0 }
  0x5a   : > { %p563_p0 = pnand %p562_p5, %p556_p3 }
  0x5b   : > { %v195_v21 = vmin.f32 %v194_v17, 1.0  ;;  %v199_v22 = vmin.f32 %v198_v18, 1.0  ;;  %v203_v23 = vmin.f32 %v202_v19, 1.0 }
  0x5d   : > { %v205_v24 = vmul.f32 %v204_v20, %v195_v21  ;;  %v208_v25 = vmul.f32 %v204_v20, %v199_v22  ;;  %v211_v26 = vmul.f32 %v204_v20, %v203_v23 }
  0x5f   : > { %v206_v27 = vmax.f32 %v205_v24, 0.0  ;;  %v209_v28 = vmax.f32 %v208_v25, 0.0  ;;  %v212_v29 = vmax.f32 %v211_v26, 0.0 }
  0x61   : > { %v207_v30 = vmin.f32 %v206_v27, 1.0  ;;  %v210_v31 = vmin.f32 %v209_v28, 1.0  ;;  %v213_v32 = vmin.f32 %v212_v29, 1.0 }
  0x63   : > { %v214_v33 = vmul.f32 0.2989, %v207_v30  ;;  %v215_v34 = vmul.f32 0.587, %v210_v31  ;;  %v217_v35 = vmul.f32 0.114, %v213_v32  ;;  %v235_v49 = vmul.f32 %v234_v46, %v207_v30 }
  0x64   : > { %v239_v50 = vmul.f32 %v234_v46, %v210_v31  ;;  %v243_v51 = vmul.f32 %v234_v46, %v213_v32  ;;  %v283_v32 = vstv %s432_s4 }
  0x65   : > { %v216_v36 = vadd.f32 %v215_v34, %v214_v33 }
  0x67   : > { %v218_v37 = vadd.f32 %v217_v35, %v216_v36 }
  0x69   : > { %v220_v38 = vsel %vm219_vm0, %v218_v37, 0.0 }
  0x6a   : > { %221 = vadd.xlane.f32.xlu0 %v220_v38 }
  0xf7   : > { %v222_v39 = vpop.xlane.xlu0 %221 }
  0xf8   : > { %v223_v40 = vsel %vm219_vm0, %v222_v39, 0.0 }
  0xf9   : > { %v224_v41 = vrot.slane %v223_v40, 4 }
  0xfb   : > { %v225_v42 = vadd.f32 %v224_v41, %v223_v40 }
  0xfd   : > { %v226_v43 = vrot.slane %v225_v42, 2 }
  0xff   : > { %v227_v44 = vadd.f32 %v226_v43, %v225_v42 }
 0x101   : > { %v228_v45 = vrot.slane %v227_v44, 1 }
 0x103   : > { %v229_v47 = vadd.f32 %v228_v45, %v227_v44 }
 0x105   : > { %v230_v52 = vmul.f32 0.00390625, %v229_v47 }
 0x107   : > { %v233_v53 = vmul.f32 %v232_v48, %v230_v52 }
 0x109   : > { %v236_v54 = vadd.f32 %v235_v49, %v233_v53  ;;  %v240_v55 = vadd.f32 %v239_v50, %v233_v53  ;;  %v244_v56 = vadd.f32 %v243_v51, %v233_v53 }
 0x10b   : > { %v237_v57 = vmax.f32 %v236_v54, 0.0  ;;  %v241_v58 = vmax.f32 %v240_v55, 0.0  ;;  %v245_v59 = vmax.f32 %v244_v56, 0.0 }
 0x10d   : > { %v238_v60 = vmin.f32 %v237_v57, 1.0  ;;  %v242_v61 = vmin.f32 %v241_v58, 1.0  ;;  %v246_v62 = vmin.f32 %v245_v59, 1.0 }
 0x10f   : > { %v247_v63 = vmax.f32 %v238_v60, %v242_v61  ;;  %v249_v0 = vmin.f32 %v238_v60, %v242_v61 }
 0x111   : > { %v790_v1 = vmax.f32 %v247_v63, %v246_v62  ;;  %v250_v2 = vmin.f32 %v249_v0, %v246_v62 }
 0x113   : > { %vm251_vm1 = vcmp.eq.f32.partialorder %v790_v1, %v250_v2  ;;  %v252_v3 = vsub.f32 %v790_v1, %v250_v2  ;;  %v259_v4 = vsub.f32 %v790_v1, %v238_v60  ;;  %v261_v5 = vsub.f32 %v790_v1, %v242_v61 }
 0x114   : > { %v253_v6 = vsel %vm251_vm1, 1.0, %v790_v1  ;;  %v263_v7 = vsub.f32 %v790_v1, %v246_v62  ;;  %vm265_vm2 = vcmp.eq.f32.partialorder %v790_v1, %v238_v60  ;;  %vm266_vm3 = vcmp.eq.f32.partialorder %v790_v1, %v242_v61 }
 0x115   : > { %506 = vrcp.f32 %v253_v6  ;;  %v255_v8 = vsel %vm251_vm1, 1.0, %v252_v3  ;;  %vm802_vm5 = vmxor %vm265_vm2, %vm629_vm4 }
 0x116   : > { %508 = vrcp.f32 %v255_v8  ;;  %vm808_vm6 = vmand %vm266_vm3, %vm802_vm5 }
 0x117   : > { %vm812_vm7 = vmxor %vm266_vm3, %vm629_vm4 }
 0x118   : > { %vm275_vm8 = vmand %vm812_vm7, %vm802_vm5 }
 0x11f   : > { %v507_v12 = vpop.eup %506 }
 0x120   : > { %v509_v13 = vpop.eup %508  ;;  %v257_v14 = vmul.f32 %v507_v12, %v252_v3 }
 0x121   : > { %v260_v15 = vmul.f32 %v509_v13, %v259_v4  ;;  %v262_v16 = vmul.f32 %v509_v13, %v261_v5  ;;  %v264_v17 = vmul.f32 %v509_v13, %v263_v7 }
 0x122   : > { %v258_v18 = vmin.f32 %v257_v14, 1.0 }
 0x123   : > { %v268_v19 = vsub.f32 %v264_v17, %v262_v16  ;;  %v271_v20 = vadd.f32 2.0, %v260_v15  ;;  %v276_v21 = vadd.f32 4.0, %v262_v16 }
 0x124   : > { %v291_v22 = vsub.f32 1.0, %v258_v18 }
 0x125   : > { %v269_v23 = vsel %vm265_vm2, %v268_v19, 0.0  ;;  %v272_v24 = vsub.f32 %v271_v20, %v264_v17  ;;  %v277_v25 = vsub.f32 %v276_v21, %v260_v15 }
 0x126   : > { %v292_v26 = vmul.f32 %v291_v22, %v790_v1 }
 0x127   : > { %v273_v27 = vsel %vm808_vm6, %v272_v24, 0.0  ;;  %v278_v28 = vsel %vm275_vm8, %v277_v25, 0.0 }
 0x128   : > { %v279_v29 = vadd.f32 %v273_v27, %v269_v23 }
 0x12a   : > { %v280_v30 = vadd.f32 %v279_v29, %v278_v28 }
 0x12c   : > { %v281_v31 = vmul.f32 0.16666667, %v280_v30 }
 0x12e   : > { %v282_v33 = vadd.f32 1.0, %v281_v31 }
 0x130   : > { %v284_v34 = vadd.f32 %v283_v32, %v282_v33 }
 0x132   : > { %v285_v35 = vfloor.f32 %v284_v34 }
 0x134   : > { %v286_v36 = vsub.f32 %v284_v34, %v285_v35 }
 0x136   : > { %v287_v37 = vmul.f32 6.0, %v286_v36 }
 0x138   : > { %v288_v38 = vfloor.f32 %v287_v37 }
 0x13a   : > { %v289_v39 = vsub.f32 %v287_v37, %v288_v38  ;;  %v290_v42 = vmin.f32 %v288_v38, 5.0 }
 0x13c   : > { %v293_v40 = vmul.f32 %v289_v39, %v258_v18  ;;  %v296_v41 = vsub.f32 1.0, %v289_v39  ;;  %vm303_vm9 = vcmp.eq.f32.partialorder %v290_v42, 3.0  ;;  %vm304_vm10 = vcmp.eq.f32.partialorder %v290_v42, 4.0 }
 0x13d   : > { %vm302_vm11 = vcmp.eq.f32.partialorder %v290_v42, 2.0  ;;  %vm301_vm12 = vcmp.eq.f32.partialorder %v290_v42, 1.0  ;;  %vm300_vm13 = vcmp.eq.f32.partialorder %v290_v42, 0.0 }
 0x13e   : > { %v294_v43 = vsub.f32 1.0, %v293_v40  ;;  %v297_v44 = vmul.f32 %v296_v41, %v258_v18 }
 0x140   : > { %v295_v45 = vmul.f32 %v294_v43, %v790_v1  ;;  %v298_v46 = vsub.f32 1.0, %v297_v44 }
 0x142   : > { %v299_v47 = vmul.f32 %v298_v46, %v790_v1  ;;  %v310_v48 = vsel %vm303_vm9, %v295_v45, %v292_v26  ;;  %v314_v49 = vsel %vm304_vm10, %v790_v1, %v295_v45 }
 0x143   : > { %v311_v50 = vsel %vm302_vm11, %v790_v1, %v310_v48  ;;  %v315_v51 = vsel %vm303_vm9, %v790_v1, %v314_v49 }
 0x144   : > { %v305_v52 = vsel %vm304_vm10, %v299_v47, %v790_v1  ;;  %v312_v53 = vsel %vm301_vm12, %v790_v1, %v311_v50  ;;  %v316_v54 = vsel %vm302_vm11, %v299_v47, %v315_v51 }
 0x145   : > { %v306_v55 = vsel %vm303_vm9, %v292_v26, %v305_v52  ;;  %v313_v56 = vsel %vm300_vm13, %v299_v47, %v312_v53  ;;  %v317_v57 = vsel %vm301_vm12, %v292_v26, %v316_v54 }
 0x146   : > { %v307_v58 = vsel %vm302_vm11, %v292_v26, %v306_v55  ;;  %v318_v59 = vsel %vm300_vm13, %v292_v26, %v317_v57  ;;  %435 = vst [vmem:[%s173_s6 + $0x2] sm:$0x3] %v313_v56 }
 0x147   : > { %v308_v60 = vsel %vm301_vm12, %v295_v45, %v307_v58  ;;  %436 = vst [vmem:[%s173_s6 + $0x4] sm:$0x3] %v318_v59 }
 0x148   : > { %v309_v61 = vsel %vm300_vm13, %v790_v1, %v308_v60 }
 0x149   : > { %319 = vst [vmem:[%s173_s6] sm:$0x3] %v309_v61 }
 0x14a   : > { %566 = shalt.err (!%p563_p0)
}
 0x14b   : > { %s567_s25 = scalar_lea.hbm %s853_s27, 96  ;;  %s571_s19 = scalar_lea.hbm %s904_s2, 192 }
 0x14c   : > { %p568_p8 = scmp.ne.s32.totalorder %s853_s27, %s567_s25  ;;  %p572_p1 = scmp.lt.u32.totalorder %s853_s27, %s904_s2 }
 0x14d   : > { %p573_p2 = scmp.lt.u32.totalorder %s571_s19, %s567_s25  ;;  %p575_p12 = scmp.lt.u32.totalorder %s567_s25, %s853_s27 }
 0x14e   : > { %p569_p9 = pnand %p568_p8, %p924_p13 }
 0x14f   : > { %p574_p11 = por %p573_p2, %p572_p1 }
 0x150   : > { %p570_p10 = pneg %p569_p9 }
 0x151   : > { %p576_p7 = por %p575_p12, %p574_p11 }
 0x153   : > { %p577_p3 = pnand %p576_p7, %p570_p10 }
 0x155   : > { %580 = shalt.err (!%p577_p3)
}
 0x156   : > { %s631_s30 = smov 32   ;;  %s632_s4 = smov 2  }
 0x157   : > { %450 = dma.vmem_to_hbm [thread:$0]  (%p924_p13), %s856_s7, 96, %s853_s27, %s325_s8, %s631_s30, %s631_s30, %s632_s4  }
 0x158 PF: > { %s353_s5 = sand.u32 1, %s611_s9   ;;  %p925_p6 = scmp.ne.s32.totalorder %s911_s22, 0 }
 0x159   : > { %p926_p4 = scmp.ge.s32.totalorder %s623_s12, 2  ;;  %s354_s6 = scalar_lea.sflag [#allocation4], %s353_s5 }
 0x15b   : > { %p461_p5 = pnand %p926_p4, %p925_p6 }
 0x15d   : > { %606 = dma.done.wait (!%p461_p5), %s354_s6, 96  }
 0x15e   : > { %608 = vsyncadd (!%p461_p5), %s354_s6, 4294967200  ;;  %p16_p0 = scmp.ge.s32.totalorder %s673_s15, 4   ;;  %s927_s9 = smov %s615_s10 }
 0x15f   : > { %s928_s10 = smov %s619_s11  ;;  %s929_s11 = smov %s685_s18 }
 0x160   : > { %s930_s12 = smov %s673_s15  ;;  %18 = sbr.rel (!%p16_p0) target bundleno = 6 (0x6), region = 82 }
 0x167   :  { %359 = vsyncpa [#allocation3], 1 }
 0x168   :  { %361 = vsyncpa [#allocation3 + $0x1], 1 }
 0x169   :  { %362 = vsyncpa [#allocation4], 1 }
 0x16a   :  { %364 = vsyncpa [#allocation4 + $0x1], 1 }
 0x16b   :  { %365 = vsyncpa [#allocation5], 1 }
 0x16c   :  { %367 = vsyncpa [#allocation5 + $0x1], 1 }

</bundles_post_ra>
